<compile_context>
chip_gen: v6e
topology: v6e:2x2x1
jax: 0.10.0
libtpu: 0.0.40
codegen_flags: <defaults>
</compile_context>

<pallas_src>
import functools

import jax
import jax.numpy as jnp
from jax import lax
from jax.experimental import pallas as pl
from jax.experimental.pallas import tpu as pltpu


def _round_up(x, m):
    return (x + m - 1) // m * m


def _patch_embed_kernel(p_ref, w_ref, b_ref, o_ref):
    # p_ref: (tile_m, K_pad)  im2col patches (streamed)
    # w_ref: (K_pad, E_pad)   conv weight, pre-transposed + lane-padded (VMEM-resident)
    # b_ref: (1, E_pad)       conv bias, f32 (VMEM-resident)
    # o_ref: (tile_m, E_pad)  f32, lane-dense -> unmasked stores
    o_ref[...] = (
        jnp.dot(p_ref[...], w_ref[...], preferred_element_type=jnp.float32)
        + b_ref[...]
    ).astype(o_ref.dtype)


def patch_embed_tokens(x, w_conv, b_conv, *, patch_size, compute_dtype=jnp.float32):
    """PatchEmbed as consumed downstream: returns (B, num_patches, embed_dim).

    x:      (B, C, H, W)  float32
    w_conv: (E, C, P, P)  PyTorch OIHW Conv2d weight
    b_conv: (E,)          Conv2d bias
    compute_dtype: set jnp.bfloat16 at production dims on v6e/v7x (f32 accumulate kept).
    """
    B, C, H, W = x.shape
    P = patch_size
    assert H % P == 0 and W % P == 0, "Input image size doesn't match model"
    E = w_conv.shape[0]
    assert w_conv.shape == (E, C, P, P)
    Hp, Wp = H // P, W // P
    K = C * P * P
    M = B * Hp * Wp

    # Lane-dense padding (exact: padded rows/cols are zero and sliced off below).
    K_pad = _round_up(K, 128)
    E_pad = _round_up(E, 128)

    # im2col: (B,C,Hp,P,Wp,P) -> (B,Hp,Wp,C,P,P) -> (M, K).  With allow_input_fusion
    # this producer may fuse into the pallas_call's input DMA instead of being a
    # separate materialized HBM round trip.
    patches = x.reshape(B, C, Hp, P, Wp, P).transpose(0, 2, 4, 1, 3, 5).reshape(M, K)
    patches = jnp.pad(patches.astype(compute_dtype), ((0, 0), (0, K_pad - K)))

    # One-time weight/bias prep (tiny, wrapper-side): OIHW -> (K, E), pre-transposed so
    # there is no in-kernel .T and the matmul output is dense along embed_dim lanes.
    w = w_conv.reshape(E, K).T.astype(compute_dtype)
    w = jnp.pad(w, ((0, K_pad - K), (0, E_pad - E)))
    b = jnp.pad(b_conv.astype(jnp.float32).reshape(1, E), ((0, 0), (0, E_pad - E)))

    # Tile the patch-row axis; single grid step while launch-latency bound (M<=1024),
    # 512-row tiles past that (fits v7x's 32 MiB scoped VMEM with double buffering).
    tile_m = M if M <= 1024 else 512
    assert M % tile_m == 0, "pad batch*num_patches to a multiple of the M tile"
    grid = (M // tile_m,)

    itemsize = jnp.dtype(compute_dtype).itemsize
    cost = pl.CostEstimate(
        flops=2 * M * K_pad * E_pad,
        transcendentals=0,
        bytes_accessed=M * K_pad * itemsize + K_pad * E_pad * itemsize + 4 * M * E_pad,
    )

    out = pl.pallas_call(
        _patch_embed_kernel,
        out_shape=jax.ShapeDtypeStruct((M, E_pad), jnp.float32),
        grid=grid,
        in_specs=[
            pl.BlockSpec((tile_m, K_pad), lambda i: (i, 0)),  # streamed patches
            pl.BlockSpec((K_pad, E_pad), lambda i: (0, 0)),   # weight: VMEM-resident
            pl.BlockSpec((1, E_pad), lambda i: (0, 0)),       # bias:   VMEM-resident
        ],
        out_specs=pl.BlockSpec((tile_m, E_pad), lambda i: (i, 0)),
        compiler_params=pltpu.CompilerParams(
            dimension_semantics=("parallel",),          # M axis splits across TCs (v7x)
            allow_input_fusion=[True, False, False],    # fuse im2col into input DMA
            vmem_limit_bytes=32 * 1024 * 1024,
        ),
        cost_estimate=cost,
    )(patches, w, b)

    # Slice off the lane padding; rows are already in (B, N, E) order.
    return out[:, :E].reshape(B, Hp * Wp, E)


def patch_embed_nchw(x, w_conv, b_conv, *, patch_size, compute_dtype=jnp.float32):
    """Exact nn.Module forward layout: Conv2d output (B, embed_dim, Hp, Wp)."""
    B, C, H, W = x.shape
    P = patch_size
    E = w_conv.shape[0]
    Hp, Wp = H // P, W // P
    tokens = patch_embed_tokens(
        x, w_conv, b_conv, patch_size=P, compute_dtype=compute_dtype
    )
    return tokens.reshape(B, Hp, Wp, E).transpose(0, 3, 1, 2)


if __name__ == "__main__":
    B, C, IMG, P, E = 2, 4, 16, 4, 32

    key = jax.random.PRNGKey(0)
    kx, kw, kb = jax.random.split(key, 3)
    x = jax.random.normal(kx, (B, C, IMG, IMG), jnp.float32)
    w_conv = 0.02 * jax.random.normal(kw, (E, C, P, P), jnp.float32)
    b_conv = 0.02 * jax.random.normal(kb, (E,), jnp.float32)

    tokens_fn = jax.jit(functools.partial(patch_embed_tokens, patch_size=P))
    nchw_fn = jax.jit(functools.partial(patch_embed_nchw, patch_size=P))

    tokens = jax.block_until_ready(tokens_fn(x, w_conv, b_conv))
    y = jax.block_until_ready(nchw_fn(x, w_conv, b_conv))

    # Pure-JAX reference: nn.Conv2d(kernel=stride=P, bias=True) forward.
    ref = lax.conv_general_dilated(
        x, w_conv, window_strides=(P, P), padding="VALID",
        dimension_numbers=("NCHW", "OIHW", "NCHW"),
        precision=lax.Precision.HIGHEST,
    ) + b_conv.reshape(1, E, 1, 1)
    ref_tokens = ref.reshape(B, E, -1).transpose(0, 2, 1)

    assert tokens.shape == (B, (IMG // P) ** 2, E), tokens.shape
    assert y.shape == (B, E, IMG // P, IMG // P), y.shape

    tok_err = float(jnp.max(jnp.abs(tokens - ref_tokens)))
    nchw_err = float(jnp.max(jnp.abs(y - ref)))
    assert tok_err < 1e-4, f"token output mismatch, max abs err {tok_err}"
    assert nchw_err < 1e-4, f"NCHW output mismatch, max abs err {nchw_err}"

    print("KERNEL_OK")
</pallas_src>

<mosaic_0001>
module attributes {stable_mosaic.version = 11 : i64} {
  func.func @_patch_embed_kernel(%arg0: i32, %arg1: memref<32x128xf32, #tpu.memory_space<vmem>>, %arg2: memref<128x128xf32, #tpu.memory_space<vmem>>, %arg3: memref<1x128xf32, #tpu.memory_space<vmem>>, %arg4: memref<32x128xf32, #tpu.memory_space<vmem>>) attributes {dimension_semantics = [#tpu.dimension_semantics<parallel>], iteration_bounds = array<i64: 1>, scalar_prefetch = 0 : i64, scratch_operands = 0 : i64, tpu.core_type = #tpu.core_type<tc>, window_params = [{transform_indices = @transform_0, window_bounds = array<i64: 32, 128>}, {pipeline_mode = #tpu.pipeline_mode<synchronous>, transform_indices = @transform_1, window_bounds = array<i64: 128, 128>}, {pipeline_mode = #tpu.pipeline_mode<synchronous>, transform_indices = @transform_2, window_bounds = array<i64: 1, 128>}, {transform_indices = @transform_3, window_bounds = array<i64: 32, 128>}]} {
    %c0 = arith.constant 0 : index
    %c0_0 = arith.constant 0 : index
    %0 = vector.load %arg1[%c0, %c0_0] : memref<32x128xf32, #tpu.memory_space<vmem>>, vector<32x128xf32>
    %c0_1 = arith.constant 0 : index
    %c0_2 = arith.constant 0 : index
    %1 = vector.load %arg2[%c0_1, %c0_2] : memref<128x128xf32, #tpu.memory_space<vmem>>, vector<128x128xf32>
    %cst = arith.constant dense<0.000000e+00> : vector<32x128xf32>
    %2 = tpu.matmul %0, %1, %cst {dimension_numbers = #tpu.dot_dimension_numbers<[1], [0], [0], [1], [0, 0, 1, 1], [], []>} : vector<32x128xf32>, vector<128x128xf32>, vector<32x128xf32> -> vector<32x128xf32>
    %c0_3 = arith.constant 0 : index
    %c0_4 = arith.constant 0 : index
    %3 = vector.load %arg3[%c0_3, %c0_4] : memref<1x128xf32, #tpu.memory_space<vmem>>, vector<1x128xf32>
    %4 = vector.broadcast %3 : vector<1x128xf32> to vector<32x128xf32>
    %5 = arith.addf %2, %4 : vector<32x128xf32>
    %c0_5 = arith.constant 0 : index
    %c0_6 = arith.constant 0 : index
    %6 = vector.load %arg4[%c0_5, %c0_6] : memref<32x128xf32, #tpu.memory_space<vmem>>, vector<32x128xf32>
    tpu.vector_store %arg4[%c0_5, %c0_6], %5 {strides = array<i32>} : memref<32x128xf32, #tpu.memory_space<vmem>>, vector<32x128xf32>,
    return
  }
  func.func @transform_0(%arg0: i32) -> (i32, i32) {
    %c0_i32 = arith.constant 0 : i32
    %c0_i32_0 = arith.constant 0 : i32
    return %arg0, %c0_i32 : i32, i32
  }
  func.func @transform_1(%arg0: i32) -> (i32, i32) {
    %c0_i32 = arith.constant 0 : i32
    %c0_i32_0 = arith.constant 0 : i32
    %c0_i32_1 = arith.constant 0 : i32
    return %c0_i32, %c0_i32_0 : i32, i32
  }
  func.func @transform_2(%arg0: i32) -> (i32, i32) {
    %c0_i32 = arith.constant 0 : i32
    %c0_i32_0 = arith.constant 0 : i32
    %c0_i32_1 = arith.constant 0 : i32
    return %c0_i32, %c0_i32_0 : i32, i32
  }
  func.func @transform_3(%arg0: i32) -> (i32, i32) {
    %c0_i32 = arith.constant 0 : i32
    %c0_i32_0 = arith.constant 0 : i32
    return %arg0, %c0_i32 : i32, i32
  }
}

</mosaic_0001>

<bundles_post_ra>
// kernel: patch_embed_tokens.2
= control target key start
LH: loop header
LB: loop body
LE: loop exit
PB: predicated region body
PF: predicated region fallthrough
CT: control target
= control target key end

     0   :  { %s417_s0 = inlined_call_operand.vmem [shape: f32[128,128], index: 0, kind: input, shape index: {}]   ;;  %s418_s1 = inlined_call_operand.vmem [shape: f32[1,128], index: 1, kind: input, shape index: {}]   ;;  %s419_s2 = inlined_call_operand.vmem [shape: f32[32,64], index: 2, kind: input, shape index: {}]   ;;  %s420_s3 = inlined_call_operand.<no memory space> [shape: f32[], index: 3, kind: input, shape index: {}]   ;;  %s421_s4 = inlined_call_operand.hbm [shape: f32[32,128], index: 4, kind: output, shape index: {}]  }
   0x1   :  { %v341_v0 = vstv %s420_s3 }
   0x2   :  { %v78_v1 = vld [vmem:[%s417_s0 + $0x78] sm:$0xff]  ;;  %v77_v2 = vld [vmem:[%s417_s0 + $0x70] sm:$0xff]  ;;  %v76_v3 = vld [vmem:[%s417_s0 + $0x68] sm:$0xff] }
   0x3   :  { %215 = vmatprep.subr.mxu0 %v78_v1  ;;  %253 = vmatprep.subr.mxu1 %v78_v1  ;;  %v75_v4 = vld [vmem:[%s417_s0 + $0x60] sm:$0xff]  ;;  %v74_v5 = vld [vmem:[%s417_s0 + $0x58] sm:$0xff] }
   0x4   :  { %216 = vmatpush3.msra.mxu0 %v78_v1  ;;  %269 = vmatpush3.msra.mxu1 %v78_v1 }
   0x5   :  { %217 = vmatprep.subr.mxu0 %v77_v2  ;;  %254 = vmatprep.subr.mxu1 %v77_v2 }
   0x6   :  { %218 = vmatpush3.msra.mxu0 %v77_v2  ;;  %270 = vmatpush3.msra.mxu1 %v77_v2 }
   0x7   :  { %219 = vmatprep.subr.mxu0 %v76_v3  ;;  %255 = vmatprep.subr.mxu1 %v76_v3 }
   0x8   :  { %220 = vmatpush3.msra.mxu0 %v76_v3  ;;  %271 = vmatpush3.msra.mxu1 %v76_v3 }
   0x9   :  { %10 = vsyncpa [#allocation8], 0  ;;  %221 = vmatprep.subr.mxu0 %v75_v4  ;;  %256 = vmatprep.subr.mxu1 %v75_v4  ;;  %v73_v6 = vld [vmem:[%s417_s0 + $0x50] sm:$0xff]  ;;  %v72_v7 = vld [vmem:[%s417_s0 + $0x48] sm:$0xff]  ;;  %v18_v12 = vlaneseq  ;;  %s310_s29 = smov [#allocation7]  }
   0xa   :  { %222 = vmatpush3.msra.mxu0 %v75_v4  ;;  %272 = vmatpush3.msra.mxu1 %v75_v4  ;;  %v71_v8 = vld [vmem:[%s417_s0 + $0x40] sm:$0xff]  ;;  %v70_v9 = vld [vmem:[%s417_s0 + $0x38] sm:$0xff]  ;;  %v69_v10 = vld [vmem:[%s417_s0 + $0x30] sm:$0xff]  ;;  %s180_s30 = sshll.u32 %s310_s29, 4  ;;  %s181_s30 = int_to_ptr.vmem [resolvable:$true] %s180_s30 }
   0xb   :  { %223 = vmatprep.subr.mxu0 %v74_v5  ;;  %257 = vmatprep.subr.mxu1 %v74_v5  ;;  %v68_v11 = vld [vmem:[%s417_s0 + $0x28] sm:$0xff]  ;;  %v67_v13 = vld [vmem:[%s417_s0 + $0x20] sm:$0xff]  ;;  %v66_v14 = vld [vmem:[%s417_s0 + $0x18] sm:$0xff]  ;;  %v19_v15 = vand.u32 127, %v18_v12  ;;  %s288_s5 = scalar_lea.vmem %s181_s30, 512  ;;  %p293_p1 = scmp.lt.s32.totalorder %s181_s30, %s181_s30 }
   0xc   :  { %224 = vmatpush3.msra.mxu0 %v74_v5  ;;  %273 = vmatpush3.msra.mxu1 %v74_v5  ;;  %v65_v16 = vld [vmem:[%s417_s0 + $0x10] sm:$0xff]  ;;  %v64_v17 = vld [vmem:[%s417_s0 + $0x8] sm:$0xff]  ;;  %v17_v18 = vld [vmem:[%s419_s2] sm:$0xff]  ;;  %p289_p0 = scmp.ne.s32.totalorder %s181_s30, %s288_s5  ;;  %p294_p2 = scmp.lt.s32.totalorder %s288_s5, %s288_s5 }
   0xd   :  { %225 = vmatprep.subr.mxu0 %v73_v6  ;;  %258 = vmatprep.subr.mxu1 %v73_v6  ;;  %vm21_vm0 = vcmp.lt.s32.totalorder %v19_v15, 64  ;;  %v192_v19 = vld [vmem:[%s419_s2 + $0x10] sm:$0xff]  ;;  %v63_v20 = vld [vmem:[%s417_s0] sm:$0xff]  ;;  %v191_v21 = vld [vmem:[%s419_s2 + $0x8] sm:$0xff] }
   0xe   :  { %226 = vmatpush3.msra.mxu0 %v73_v6  ;;  %274 = vmatpush3.msra.mxu1 %v73_v6  ;;  %v193_v22 = vld [vmem:[%s419_s2 + $0x18] sm:$0xff]  ;;  %v22_v23 = vsel %vm21_vm0, %v17_v18, %v341_v0  ;;  %v43_v24 = vsel %vm21_vm0, %v192_v19, %v341_v0  ;;  %v32_v25 = vsel %vm21_vm0, %v191_v21, %v341_v0  ;;  %v194_v27 = vld [vmem:[%s418_s1] ss:$0 sm:$0xff]  ;;  %p295_p3 = por %p294_p2, %p293_p1 }
   0xf   :  { %227 = vmatprep.subr.mxu0 %v72_v7  ;;  %259 = vmatprep.subr.mxu1 %v72_v7  ;;  %v54_v26 = vsel %vm21_vm0, %v193_v22, %v341_v0 }
  0x10   :  { %228 = vmatpush3.msra.mxu0 %v72_v7  ;;  %275 = vmatpush3.msra.mxu1 %v72_v7  ;;  %p296_p4 = pnand %p295_p3, %p289_p0 }
  0x11   :  { %229 = vmatprep.subr.mxu0 %v71_v8  ;;  %260 = vmatprep.subr.mxu1 %v71_v8 }
  0x12   :  { %230 = vmatpush3.msra.mxu0 %v71_v8  ;;  %276 = vmatpush3.msra.mxu1 %v71_v8 }
  0x13   :  { %231 = vmatprep.subr.mxu0 %v70_v9  ;;  %261 = vmatprep.subr.mxu1 %v70_v9 }
  0x14   :  { %232 = vmatpush3.msra.mxu0 %v70_v9  ;;  %277 = vmatpush3.msra.mxu1 %v70_v9 }
  0x15   :  { %233 = vmatprep.subr.mxu0 %v69_v10  ;;  %262 = vmatprep.subr.mxu1 %v69_v10 }
  0x16   :  { %234 = vmatpush3.msra.mxu0 %v69_v10  ;;  %278 = vmatpush3.msra.mxu1 %v69_v10 }
  0x17   :  { %235 = vmatprep.subr.mxu0 %v68_v11  ;;  %263 = vmatprep.subr.mxu1 %v68_v11 }
  0x18   :  { %236 = vmatpush3.msra.mxu0 %v68_v11  ;;  %279 = vmatpush3.msra.mxu1 %v68_v11 }
  0x19   :  { %237 = vmatprep.subr.mxu0 %v67_v13  ;;  %264 = vmatprep.subr.mxu1 %v67_v13 }
  0x1a   :  { %238 = vmatpush3.msra.mxu0 %v67_v13  ;;  %280 = vmatpush3.msra.mxu1 %v67_v13 }
  0x1b   :  { %239 = vmatprep.subr.mxu0 %v66_v14  ;;  %265 = vmatprep.subr.mxu1 %v66_v14 }
  0x1c   :  { %240 = vmatpush3.msra.mxu0 %v66_v14  ;;  %281 = vmatpush3.msra.mxu1 %v66_v14 }
  0x1d   :  { %241 = vmatprep.subr.mxu0 %v65_v16  ;;  %266 = vmatprep.subr.mxu1 %v65_v16 }
  0x1e   :  { %242 = vmatpush3.msra.mxu0 %v65_v16  ;;  %282 = vmatpush3.msra.mxu1 %v65_v16 }
  0x1f   :  { %243 = vmatprep.subr.mxu0 %v64_v17  ;;  %267 = vmatprep.subr.mxu1 %v64_v17 }
  0x20   :  { %244 = vmatpush3.msra.mxu0 %v64_v17  ;;  %283 = vmatpush3.msra.mxu1 %v64_v17 }
  0x21   :  { %245 = vmatprep.subr.mxu0 %v63_v20  ;;  %268 = vmatprep.subr.mxu1 %v63_v20 }
  0x22   :  { %246 = vmatpush3.msra.mxu0 %v63_v20  ;;  %284 = vmatpush3.msra.mxu1 %v63_v20 }
  0x23   :  { %247 = vmatprep.mubr.f32.mxu0 %v22_v23  ;;  %250 = vmatprep.mubr.f32.mxu1 %v43_v24 }
  0x24   :  { %248 = vmatmul.mubr.f32.vlgmr.msra.gmra.mxu0 %v32_v25  ;;  %251 = vmatmul.mubr.f32.vlgmr.msra.gmra.mxu1 %v54_v26 }
  0xe4   :  { %v249_v28 = vpop.f32.mrf.mxu0  ;;  %v252_v29 = vpop.f32.mrf.mxu1 }
  0xe5   :  { %v158_v30 = vadd.f32 %v249_v28, %v194_v27  ;;  %v168_v31 = vadd.f32 %v252_v29, %v194_v27 }
  0xe6   :  { %v152_v32 = vpop.f32.mrf.mxu0  ;;  %v162_v33 = vpop.f32.mrf.mxu1 }
  0xe7   :  { %172 = vst [vmem:[#allocation7 + $0x8] sm:$0xff] %v158_v30  ;;  %174 = vst [vmem:[#allocation7 + $0x18] sm:$0xff] %v168_v31  ;;  %v153_v34 = vadd.f32 %v194_v27, %v152_v32  ;;  %v163_v35 = vadd.f32 %v194_v27, %v162_v33 }
  0xe9   :  { %171 = vst [vmem:[#allocation7] sm:$0xff] %v153_v34  ;;  %173 = vst [vmem:[#allocation7 + $0x10] sm:$0xff] %v163_v35 }
  0xea   :  { %299 = shalt.err (!%p296_p4)
}
  0xeb   :  { %s311_s1 = smov 128   ;;  %s312_s6 = smov 8  }
  0xec   :  { %186 = dma.vmem_to_hbm [thread:$0]  %s181_s30, 512, %s421_s4, [#allocation8], %s311_s1, %s311_s1, %s312_s6  }
  0xed   :  { %308 = dma.done.wait [#allocation8], 512  }
  0xee   :  { %309 = vsyncadd [#allocation8], 4294966784 }
  0xef   :  { %190 = vsyncpa [#allocation8], 1 }

</bundles_post_ra>
